<compile_context>
chip_gen: v5e
topology: v5e:2x2
jax: 0.10.0
libtpu: 0.0.40
codegen_flags: <defaults>
</compile_context>

<pallas_src>
import functools

import numpy as np
import jax
import jax.numpy as jnp
from jax.experimental import pallas as pl
from jax.experimental.pallas import tpu as pltpu


_LANE = 128            # lane width of a vreg; qubits 0..6 live in lane bits
_LANE_QUBITS = 7
_MAX_UNROLLED_LAYERS = 12


# -----------------------------------------------------------------------------
# One-time probe: pin down pltpu.roll's direction convention so the XOR-pair
# selection below is convention-independent.  np.roll convention means
# roll(x, k)[i] == x[(i - k) % N].
# -----------------------------------------------------------------------------
@functools.lru_cache(maxsize=None)
def _roll_matches_numpy():
    x = jnp.arange(_LANE, dtype=jnp.float32).reshape(1, _LANE)

    def probe_kernel(x_ref, o_ref):
        o_ref[...] = pltpu.roll(x_ref[...], 1, 1)

    out = pl.pallas_call(
        probe_kernel,
        out_shape=jax.ShapeDtypeStruct((1, _LANE), jnp.float32),
        in_specs=[pl.BlockSpec(memory_space=pltpu.MemorySpace.VMEM)],
        out_specs=pl.BlockSpec(memory_space=pltpu.MemorySpace.VMEM),
    )(x)
    return float(jax.device_get(out)[0, 0]) == float(_LANE - 1)


# -----------------------------------------------------------------------------
# Pallas kernel: structured statevector evolution, everything stays on-chip.
# -----------------------------------------------------------------------------
def _circuit_kernel(cos_ref, sin_ref, probs_ref, *, num_qubits, layers,
                    rows, roll_like_numpy):
    """cos_ref/sin_ref: (layers, num_qubits) f32 in SMEM (cos/sin of theta/2).
    probs_ref: (rows, 128) f32 in VMEM, lane-dense |amplitude|^2.
    Flat state index i = row*128 + lane; qubit q = bit q of i (Qiskit LSB
    convention): lane bit q for q < 7, row bit (q-7) for q >= 7."""
    lane = jax.lax.broadcasted_iota(jnp.int32, (rows, _LANE), 1)
    row = jax.lax.broadcasted_iota(jnp.int32, (rows, _LANE), 0)

    def qubit_bit(q):
        if q < _LANE_QUBITS:
            return (lane >> q) & 1
        return (row >> (q - _LANE_QUBITS)) & 1

    def xor_partner(v, q):
        # partner[i] = v[i ^ 2**q]: two XLU rolls + a VPU select.  The
        # circular wrap over padded lanes never feeds a valid index because
        # 2**n (and 128) are multiples of 2**(q+1).
        if q < _LANE_QUBITS:
            size, shift, axis = _LANE, 1 << q, 1
        else:
            size, shift, axis = rows, 1 << (q - _LANE_QUBITS), 0
        if roll_like_numpy:
            fwd = pltpu.roll(v, size - shift, axis)   # fwd[i] = v[i + shift]
            bwd = pltpu.roll(v, shift, axis)          # bwd[i] = v[i - shift]
        else:
            fwd = pltpu.roll(v, shift, axis)
            bwd = pltpu.roll(v, size - shift, axis)
        return jnp.where(qubit_bit(q) == 0, fwd, bwd)

    def apply_layer(l, v):
        # RY on every qubit (disjoint qubits -> order irrelevant).
        for q in range(num_qubits):
            c = cos_ref[l, q]
            s = sin_ref[l, q]
            sign = jnp.where(qubit_bit(q) == 1, 1.0, -1.0).astype(jnp.float32)
            v = c * v + (s * sign) * xor_partner(v, q)
        # CX chain in circuit order: CX(0,1), CX(1,2), ... (pure permutation).
        for q in range(num_qubits - 1):
            v = jnp.where(qubit_bit(q) == 0, v, xor_partner(v, q + 1))
        return v

    state = jnp.where((row == 0) & (lane == 0), 1.0, 0.0).astype(jnp.float32)
    if layers <= _MAX_UNROLLED_LAYERS:
        for l in range(layers):                 # static -> fully unrolled
            state = apply_layer(l, state)
    else:
        # Cap the unroll for deep circuits: bounded code size / live ranges.
        state = jax.lax.fori_loop(0, layers, apply_layer, state)

    probs_ref[...] = state * state              # real circuit -> |amp|^2


# -----------------------------------------------------------------------------
# Forward wrapper (matches the PyTorch module's forward semantics).
# -----------------------------------------------------------------------------
def custom_circuit_qnn_forward(x, params, num_qubits, layers):
    batch = x.shape[0]          # x only contributes its batch size, as in torch
    dim = 2 ** num_qubits
    rows = max(1, dim // _LANE)

    thetas = jnp.reshape(params.astype(jnp.float32), (layers, num_qubits))
    cos_half = jnp.cos(thetas * 0.5)
    sin_half = jnp.sin(thetas * 0.5)

    kernel = functools.partial(
        _circuit_kernel, num_qubits=num_qubits, layers=layers, rows=rows,
        roll_like_numpy=_roll_matches_numpy())

    probs2d = pl.pallas_call(
        kernel,
        out_shape=jax.ShapeDtypeStruct((rows, _LANE), jnp.float32),
        in_specs=[pl.BlockSpec(memory_space=pltpu.MemorySpace.SMEM),
                  pl.BlockSpec(memory_space=pltpu.MemorySpace.SMEM)],
        out_specs=pl.BlockSpec(memory_space=pltpu.MemorySpace.VMEM),
    )(cos_half, sin_half)

    probs = jnp.reshape(probs2d, (rows * _LANE,))[:dim]

    # counts.get('1', 0) / sum(counts): Qiskit zero-pads measurement keys to
    # num_qubits characters, so the key '1' only exists when num_qubits == 1;
    # otherwise the probability is statically 0.  The (batch, 1) replication
    # is a trivial wrapper-side broadcast.
    # TODO(synk): Aer's 1024-shot sampling noise is not reproduced; the exact
    # probability is returned instead.
    if num_qubits == 1:
        p1 = probs[1]
    else:
        p1 = jnp.float32(0.0)
    out = jnp.full((batch, 1), p1, dtype=jnp.float32)
    return out, probs


# -----------------------------------------------------------------------------
# Dense float64 numpy reference (verification only; never runs on the TPU).
# -----------------------------------------------------------------------------
def reference_forward(params, num_qubits, layers, batch):
    params = np.asarray(params, dtype=np.float64)
    dim = 2 ** num_qubits

    def ry(t):
        c, s = np.cos(t / 2.0), np.sin(t / 2.0)
        return np.array([[c, -s], [s, c]], dtype=np.float64)

    def cx(control, target):
        idx = np.arange(dim)
        flipped = idx ^ (((idx >> control) & 1) << target)
        p = np.zeros((dim, dim), dtype=np.float64)
        p[flipped, idx] = 1.0
        return p

    cx_chain = np.eye(dim, dtype=np.float64)
    for q in range(num_qubits - 1):
        cx_chain = cx(q, q + 1) @ cx_chain

    state = np.zeros(dim, dtype=np.float64)
    state[0] = 1.0
    for l in range(layers):
        thetas = params[l * num_qubits:(l + 1) * num_qubits]
        ry_full = ry(thetas[num_qubits - 1])
        for q in range(num_qubits - 2, -1, -1):
            ry_full = np.kron(ry_full, ry(thetas[q]))
        state = cx_chain @ (ry_full @ state)
    probs = state * state
    p1 = probs[1] if num_qubits == 1 else 0.0
    return (np.full((batch, 1), p1, dtype=np.float32),
            probs.astype(np.float32))


if __name__ == "__main__":
    key = jax.random.PRNGKey(0)
    k_params, k_x, k_params1 = jax.random.split(key, 3)

    # Case 1: num_qubits=5, layers=3.  Multi-qubit: the key '1' never occurs,
    # so the module output is exactly 0; the full measurement distribution is
    # still checked against the float64 reference.
    num_qubits, layers, batch = 5, 3, 2
    params = jax.random.uniform(k_params, (num_qubits * layers,), jnp.float32)
    x = jax.random.normal(k_x, (batch, 4), jnp.float32)   # only x.shape[0] matters

    out, probs = custom_circuit_qnn_forward(x, params, num_qubits, layers)
    out = jax.block_until_ready(out)
    probs = jax.block_until_ready(probs)
    ref_out, ref_probs = reference_forward(params, num_qubits, layers, batch)
    assert out.shape == (batch, 1)
    np.testing.assert_allclose(np.asarray(out), ref_out, atol=1e-5)
    np.testing.assert_allclose(np.asarray(probs), ref_probs, atol=1e-5)

    # Case 2: num_qubits=1, layers=4 (nontrivial: key '1' exists in counts).
    nq1, ly1 = 1, 4
    params1 = jax.random.uniform(k_params1, (nq1 * ly1,), jnp.float32)
    out1, probs1 = custom_circuit_qnn_forward(x, params1, nq1, ly1)
    out1 = jax.block_until_ready(out1)
    probs1 = jax.block_until_ready(probs1)
    ref_out1, ref_probs1 = reference_forward(params1, nq1, ly1, batch)
    np.testing.assert_allclose(np.asarray(out1), ref_out1, atol=1e-5)
    np.testing.assert_allclose(np.asarray(probs1), ref_probs1, atol=1e-5)

    print("KERNEL_OK")
</pallas_src>

<mosaic_0001>
module attributes {stable_mosaic.version = 11 : i64} {
  func.func @probe_kernel(%arg0: memref<1x128xf32, #tpu.memory_space<vmem>>, %arg1: memref<1x128xf32, #tpu.memory_space<vmem>>) attributes {dimension_semantics = [], scalar_prefetch = 0 : i64, scratch_operands = 0 : i64, tpu.core_type = #tpu.core_type<tc>} {
    %c0 = arith.constant 0 : index
    %c0_0 = arith.constant 0 : index
    %0 = vector.load %arg0[%c0, %c0_0] : memref<1x128xf32, #tpu.memory_space<vmem>>, vector<1x128xf32>
    %c1_i32 = arith.constant 1 : i32
    %1 = tpu.dynamic_rotate %0 by %c1_i32 dim 1 : vector<1x128xf32>, i32 -> vector<1x128xf32>
    %c0_1 = arith.constant 0 : index
    %c0_2 = arith.constant 0 : index
    %2 = vector.load %arg1[%c0_1, %c0_2] : memref<1x128xf32, #tpu.memory_space<vmem>>, vector<1x128xf32>
    tpu.vector_store %arg1[%c0_1, %c0_2], %1 {strides = array<i32>} : memref<1x128xf32, #tpu.memory_space<vmem>>, vector<1x128xf32>,
    return
  }
}

</mosaic_0001>

<bundles_post_ra>
// kernel: tpu_custom_call.1
= control target key start
LH: loop header
LB: loop body
LE: loop exit
PB: predicated region body
PF: predicated region fallthrough
CT: control target
= control target key end

     0   :  { %6 = vsyncpa [#allocation3], 0  ;;  %s118_s0 = inlined_call_operand.hbm [shape: f32[1,128], index: 0, kind: input, shape index: {}]   ;;  %s119_s1 = inlined_call_operand.hbm [shape: f32[1,128], index: 1, kind: output, shape index: {}]  }
   0x1   :  { %7 = vsyncpa [#allocation4], 0  ;;  %s13_s8 = sshll.u32 %s118_s0, 4  ;;  %s99_s9 = smov [#allocation2]   ;;  %s14_s8 = int_to_ptr.hbm [resolvable:$true] %s13_s8 }
   0x2   :  { %s15_s10 = sshll.u32 %s99_s9, 4  ;;  %s16_s10 = int_to_ptr.vmem [resolvable:$true] %s15_s10 }
   0x3   :  { %18 = dma.hbm_to_vmem [thread:$0]  %s14_s8, 16, %s16_s10, [#allocation3]  }
   0x4   :  { %95 = dma.done.wait [#allocation3], 16  }
   0x5   :  { %96 = vsyncadd [#allocation3], 4294967280  ;;  %v23_v0 = vld [vmem:[#allocation2] sm:$0x1]  ;;  %s100_s11 = smov 1   ;;  %s101_s12 = smov [#allocation5]  }
   0x6   :  { %24 = vrot.lane.b32.xlu0 %v23_v0, %s100_s11  ;;  %s32_s13 = sshll.u32 %s101_s12, 4  ;;  %s34_s16 = sshll.u32 %s119_s1, 4  ;;  %s33_s13 = int_to_ptr.vmem [resolvable:$true] %s32_s13  ;;  %s35_s16 = int_to_ptr.hbm [resolvable:$true] %s34_s16 }
  0x78   :  { %v25_v1 = vpop.permute.xlu0 %24 }
  0x79   :  { %26 = vst [vmem:[#allocation5] sm:$0x1] %v25_v1 }
  0x7a   :  { %37 = dma.vmem_to_hbm [thread:$0]  %s33_s13, 16, %s35_s16, [#allocation4]  }
  0x7b   :  { %97 = dma.done.wait [#allocation4], 16  }
  0x7c   :  { %98 = vsyncadd [#allocation4], 4294967280 }
  0x7d   :  { %42 = vsyncpa [#allocation3], 1 }
  0x7e   :  { %43 = vsyncpa [#allocation4], 1 }

</bundles_post_ra>
